<compile_context>
chip_gen: v7x
topology: tpu7x:2x2x1
jax: 0.10.0
libtpu: 0.0.40
codegen_flags: <defaults>
</compile_context>

<pallas_src>
import jax
import jax.numpy as jnp
import numpy as np
from jax.experimental import pallas as pl
from jax.experimental.pallas import tpu as pltpu

LN_EPS = 1e-5  # torch.nn.LayerNorm default eps


def variance_predictor_kernel(x_ref, mask_ref,
                              w1_ref, b1_ref, g1_ref, be1_ref,
                              w2_ref, b2_ref, g2_ref, be2_ref,
                              wl_ref, bl_ref,
                              out_ref):
    T = x_ref.shape[0]
    md = w1_ref.dtype                         # matmul operand dtype (bf16 or f32)

    # ---- hoisted parameter loads: once per grid step, all kept in f32 vregs ----
    b1, g1, be1 = b1_ref[...], g1_ref[...], be1_ref[...]
    b2, g2, be2 = b2_ref[...], g2_ref[...], be2_ref[...]
    wl, bl = wl_ref[...], bl_ref[...]

    # Edge-validity masks for the K=3 'same' convolution (column vectors that
    # broadcast over the channel lanes).
    t_idx = jax.lax.broadcasted_iota(jnp.int32, (T, 1), 0)
    has_prev = t_idx >= 1            # row t has a valid t-1 neighbour
    has_next = t_idx <= T - 2        # row t has a valid t+1 neighbour

    def conv_relu_ln(h, w_ref, bias, gamma, beta):
        # K=3 conv over time as ONE fused matmul: build (T, 3*C_in) im2col along
        # the lane axis.  Time shifts are XLU sublane rolls + edge masking (zero
        # padding semantics), done on 32-bit data.
        h_prev = jnp.where(has_prev, pltpu.roll(h, shift=1, axis=0), 0.0)      # h[t-1]
        h_next = jnp.where(has_next, pltpu.roll(h, shift=T - 1, axis=0), 0.0)  # h[t+1]
        cols = jnp.concatenate([h_prev, h, h_next], axis=-1)                   # (T, 3*C_in)
        y = jnp.dot(cols.astype(md), w_ref[...],                               # MXU, f32 acc
                    preferred_element_type=jnp.float32) + bias                 # (T, C_out)
        y = jnp.maximum(y, 0.0)                                                # ReLU
        mu = jnp.mean(y, axis=-1, keepdims=True)                               # LayerNorm (f32)
        var = jnp.mean(jnp.square(y - mu), axis=-1, keepdims=True)
        return (y - mu) * jax.lax.rsqrt(var + LN_EPS) * gamma + beta

    x = x_ref[...].astype(jnp.float32)                 # (T, H)
    h = conv_relu_ln(x, w1_ref, b1, g1, be1)           # conv1d_1 + relu_1 + layer_norm_1
    h = conv_relu_ln(h, w2_ref, b2, g2, be2)           # conv1d_2 + relu_2 + layer_norm_2
    # dropout_1 / dropout_2: identity at inference.

    # linear_layer: Linear(F, 1).  An N=1 matmul wastes MXU columns, so do it on
    # the VPU as broadcast-multiply + lane reduction.
    proj = jnp.sum(h * wl, axis=-1, keepdims=True) + bl        # (T, 1)
    proj = jnp.where(mask_ref[...] != 0, 0.0, proj)            # masked_fill(mask, 0.0)
    out_ref[...] = proj.astype(out_ref.dtype)


def variance_predictor(x, mask, params, *, matmul_dtype=jnp.bfloat16):
    """x: (B, T, H) float; mask: (B, T) bool/int (True = padded). Returns (B, T) f32."""
    w1, b1, g1, be1, w2, b2, g2, be2, wl, bl = params
    B, T, H = x.shape
    K, _, F = w1.shape
    assert K == 3, "conv1d_2 uses padding=1, which assumes kernel_size == 3"
    assert T % 8 == 0, "pad the time axis to a multiple of 8 sublanes before calling"

    # Wrapper-side layout plumbing (no compute hoisting):
    #  * conv weights (K, C_in, C_out) -> (K*C_in, C_out), tap-major, cast to the
    #    matmul dtype (bf16 halves weight DMA and doubles MXU rate on v6e/v7x).
    #  * 1-D params -> (1, C) f32 rows so they broadcast from lanes in-kernel.
    w1f = w1.reshape(K * H, F).astype(matmul_dtype)
    w2f = w2.reshape(K * F, F).astype(matmul_dtype)
    row = lambda v: v.reshape(1, -1).astype(jnp.float32)
    kparams = (w1f, row(b1), row(g1), row(be1),
               w2f, row(b2), row(g2), row(be2),
               row(wl), row(bl))

    x_in = x.astype(matmul_dtype)                       # halves activation DMA for bf16
    mask_in = mask.astype(jnp.int32).reshape(B, T, 1)   # (T, 1) per grid step

    def pinned(p):                                      # whole param resident in VMEM
        n = p.ndim
        return pl.BlockSpec(p.shape, lambda b, n=n: (0,) * n)

    out = pl.pallas_call(
        variance_predictor_kernel,
        grid=(B,),
        in_specs=[
            pl.BlockSpec((None, T, H), lambda b: (b, 0, 0)),   # one sequence per step
            pl.BlockSpec((None, T, 1), lambda b: (b, 0, 0)),   # its mask
            *[pinned(p) for p in kparams],
        ],
        out_specs=pl.BlockSpec((None, T, 1), lambda b: (b, 0, 0)),
        out_shape=jax.ShapeDtypeStruct((B, T, 1), jnp.float32),
        compiler_params=pltpu.CompilerParams(
            dimension_semantics=("parallel",),      # shards batch across 2 TCs on v7x
            vmem_limit_bytes=32 * 1024 * 1024),     # fits the 64 MiB/TC budget on v7x
    )(x_in, mask_in, *kparams)
    return out[..., 0]                                   # squeeze(-1) -> (B, T)


def ref_forward(x, mask_bool, params):
    """Independent pure-JAX reference using lax.conv_general_dilated."""
    w1, b1, g1, be1, w2, b2, g2, be2, wl, bl = params

    def conv(h, w, b, pad):
        y = jax.lax.conv_general_dilated(
            h, w, window_strides=(1,), padding=[(pad, pad)],
            dimension_numbers=('NWC', 'WIO', 'NWC'))
        return y + b

    def ln(h, g, bb):
        mu = h.mean(-1, keepdims=True)
        var = ((h - mu) ** 2).mean(-1, keepdims=True)
        return (h - mu) / jnp.sqrt(var + LN_EPS) * g + bb

    K = w1.shape[0]
    h = jnp.maximum(conv(x, w1, b1, (K - 1) // 2), 0.0)
    h = ln(h, g1, be1)
    h = jnp.maximum(conv(h, w2, b2, 1), 0.0)
    h = ln(h, g2, be2)
    out = h @ wl[0] + bl[0]                  # Linear(F, 1) then squeeze(-1)
    return jnp.where(mask_bool, 0.0, out)


if __name__ == "__main__":
    # model_config-implied sizes: encoder_hidden = filter_size = 32, kernel = 3
    B, T, H, F, K = 2, 16, 32, 32, 3

    key = jax.random.PRNGKey(0)
    ks = jax.random.split(key, 12)

    # torch Conv1d weight is (C_out, C_in, K); stored here taps-major (K, C_in, C_out).
    w1 = 0.1 * jax.random.normal(ks[0], (K, H, F), jnp.float32)
    b1 = 0.1 * jax.random.normal(ks[1], (F,), jnp.float32)
    g1 = 1.0 + 0.1 * jax.random.normal(ks[2], (F,), jnp.float32)
    be1 = 0.1 * jax.random.normal(ks[3], (F,), jnp.float32)
    w2 = 0.1 * jax.random.normal(ks[4], (K, F, F), jnp.float32)
    b2 = 0.1 * jax.random.normal(ks[5], (F,), jnp.float32)
    g2 = 1.0 + 0.1 * jax.random.normal(ks[6], (F,), jnp.float32)
    be2 = 0.1 * jax.random.normal(ks[7], (F,), jnp.float32)
    wl = 0.1 * jax.random.normal(ks[8], (1, F), jnp.float32)   # torch Linear: (out=1, in=F)
    bl = 0.1 * jax.random.normal(ks[9], (1,), jnp.float32)
    params = (w1, b1, g1, be1, w2, b2, g2, be2, wl, bl)

    x = jax.random.normal(ks[10], (B, T, H), jnp.float32)
    lengths = jnp.array([12, 9], jnp.int32)
    mask = jnp.arange(T)[None, :] >= lengths[:, None]          # True = padded position

    ref = jax.block_until_ready(ref_forward(x, mask, params))

    # float32 matmul path: tight structural check against the reference.
    out_f32 = jax.block_until_ready(
        variance_predictor(x, mask, params, matmul_dtype=jnp.float32))
    assert out_f32.shape == (B, T)
    np.testing.assert_allclose(np.asarray(out_f32), np.asarray(ref), atol=1e-4, rtol=1e-4)

    # bfloat16 matmul path (production setting for v6e/v7x): f32 accumulation and
    # f32 LayerNorm keep the error small; tolerance loosened for bf16 operands.
    out_bf16 = jax.block_until_ready(
        variance_predictor(x, mask, params, matmul_dtype=jnp.bfloat16))
    assert out_bf16.shape == (B, T)
    np.testing.assert_allclose(np.asarray(out_bf16), np.asarray(ref), atol=5e-2, rtol=5e-2)

    print("KERNEL_OK")
</pallas_src>

<mosaic_0001>
module attributes {stable_mosaic.version = 11 : i64} {
  func.func @variance_predictor_kernel(%arg0: i32, %arg1: memref<1x16x32xf32, #tpu.memory_space<vmem>>, %arg2: memref<1x16x1xi32, #tpu.memory_space<vmem>>, %arg3: memref<96x32xf32, #tpu.memory_space<vmem>>, %arg4: memref<1x32xf32, #tpu.memory_space<vmem>>, %arg5: memref<1x32xf32, #tpu.memory_space<vmem>>, %arg6: memref<1x32xf32, #tpu.memory_space<vmem>>, %arg7: memref<96x32xf32, #tpu.memory_space<vmem>>, %arg8: memref<1x32xf32, #tpu.memory_space<vmem>>, %arg9: memref<1x32xf32, #tpu.memory_space<vmem>>, %arg10: memref<1x32xf32, #tpu.memory_space<vmem>>, %arg11: memref<1x32xf32, #tpu.memory_space<vmem>>, %arg12: memref<1x1xf32, #tpu.memory_space<vmem>>, %arg13: memref<1x16x1xf32, #tpu.memory_space<vmem>>) attributes {dimension_semantics = [#tpu.dimension_semantics<parallel>], iteration_bounds = array<i64: 2>, scalar_prefetch = 0 : i64, scratch_operands = 0 : i64, tpu.core_type = #tpu.core_type<tc>, window_params = [{transform_indices = @transform_0, window_bounds = array<i64: 1, 16, 32>}, {transform_indices = @transform_1, window_bounds = array<i64: 1, 16, 1>}, {pipeline_mode = #tpu.pipeline_mode<synchronous>, transform_indices = @transform_2, window_bounds = array<i64: 96, 32>}, {pipeline_mode = #tpu.pipeline_mode<synchronous>, transform_indices = @transform_3, window_bounds = array<i64: 1, 32>}, {pipeline_mode = #tpu.pipeline_mode<synchronous>, transform_indices = @transform_4, window_bounds = array<i64: 1, 32>}, {pipeline_mode = #tpu.pipeline_mode<synchronous>, transform_indices = @transform_5, window_bounds = array<i64: 1, 32>}, {pipeline_mode = #tpu.pipeline_mode<synchronous>, transform_indices = @transform_6, window_bounds = array<i64: 96, 32>}, {pipeline_mode = #tpu.pipeline_mode<synchronous>, transform_indices = @transform_7, window_bounds = array<i64: 1, 32>}, {pipeline_mode = #tpu.pipeline_mode<synchronous>, transform_indices = @transform_8, window_bounds = array<i64: 1, 32>}, {pipeline_mode = #tpu.pipeline_mode<synchronous>, transform_indices = @transform_9, window_bounds = array<i64: 1, 32>}, {pipeline_mode = #tpu.pipeline_mode<synchronous>, transform_indices = @transform_10, window_bounds = array<i64: 1, 32>}, {pipeline_mode = #tpu.pipeline_mode<synchronous>, transform_indices = @transform_11, window_bounds = array<i64: 1, 1>}, {transform_indices = @transform_12, window_bounds = array<i64: 1, 16, 1>}]} {
    %c0 = arith.constant 0 : index
    %c0_0 = arith.constant 0 : index
    %0 = vector.load %arg4[%c0, %c0_0] : memref<1x32xf32, #tpu.memory_space<vmem>>, vector<1x32xf32>
    %c0_1 = arith.constant 0 : index
    %c0_2 = arith.constant 0 : index
    %1 = vector.load %arg5[%c0_1, %c0_2] : memref<1x32xf32, #tpu.memory_space<vmem>>, vector<1x32xf32>
    %c0_3 = arith.constant 0 : index
    %c0_4 = arith.constant 0 : index
    %2 = vector.load %arg6[%c0_3, %c0_4] : memref<1x32xf32, #tpu.memory_space<vmem>>, vector<1x32xf32>
    %c0_5 = arith.constant 0 : index
    %c0_6 = arith.constant 0 : index
    %3 = vector.load %arg8[%c0_5, %c0_6] : memref<1x32xf32, #tpu.memory_space<vmem>>, vector<1x32xf32>
    %c0_7 = arith.constant 0 : index
    %c0_8 = arith.constant 0 : index
    %4 = vector.load %arg9[%c0_7, %c0_8] : memref<1x32xf32, #tpu.memory_space<vmem>>, vector<1x32xf32>
    %c0_9 = arith.constant 0 : index
    %c0_10 = arith.constant 0 : index
    %5 = vector.load %arg10[%c0_9, %c0_10] : memref<1x32xf32, #tpu.memory_space<vmem>>, vector<1x32xf32>
    %c0_11 = arith.constant 0 : index
    %c0_12 = arith.constant 0 : index
    %6 = vector.load %arg11[%c0_11, %c0_12] : memref<1x32xf32, #tpu.memory_space<vmem>>, vector<1x32xf32>
    %c0_13 = arith.constant 0 : index
    %c0_14 = arith.constant 0 : index
    %7 = vector.load %arg12[%c0_13, %c0_14] : memref<1x1xf32, #tpu.memory_space<vmem>>, vector<1x1xf32>
    %8 = tpu.iota {dimensions = array<i32: 0>} : vector<16x1xi32>
    %c1_i32 = arith.constant 1 : i32
    %9 = vector.broadcast %c1_i32 : i32 to vector<16x1xi32>
    %10 = arith.cmpi sge, %8, %9 : vector<16x1xi32>
    %c14_i32 = arith.constant 14 : i32
    %11 = vector.broadcast %c14_i32 : i32 to vector<16x1xi32>
    %12 = arith.cmpi sle, %8, %11 : vector<16x1xi32>
    %c0_15 = arith.constant 0 : index
    %c0_16 = arith.constant 0 : index
    %c0_17 = arith.constant 0 : index
    %13 = vector.load %arg1[%c0_15, %c0_16, %c0_17] : memref<1x16x32xf32, #tpu.memory_space<vmem>>, vector<1x16x32xf32>
    %14 = vector.shape_cast %13 : vector<1x16x32xf32> to vector<16x32xf32>
    %c1_i32_18 = arith.constant 1 : i32
    %15 = tpu.dynamic_rotate %14 by %c1_i32_18 dim 0 : vector<16x32xf32>, i32 -> vector<16x32xf32>
    %cst = arith.constant 0.000000e+00 : f32
    %16 = vector.shape_cast %10 : vector<16x1xi1> to vector<16x1xi1>
    %17 = vector.broadcast %16 : vector<16x1xi1> to vector<16x32xi1>
    %18 = vector.broadcast %cst : f32 to vector<16x32xf32>
    %19 = arith.select %17, %15, %18 : vector<16x32xi1>, vector<16x32xf32>
    %c15_i32 = arith.constant 15 : i32
    %20 = tpu.dynamic_rotate %14 by %c15_i32 dim 0 : vector<16x32xf32>, i32 -> vector<16x32xf32>
    %cst_19 = arith.constant 0.000000e+00 : f32
    %21 = vector.shape_cast %12 : vector<16x1xi1> to vector<16x1xi1>
    %22 = vector.broadcast %21 : vector<16x1xi1> to vector<16x32xi1>
    %23 = vector.broadcast %cst_19 : f32 to vector<16x32xf32>
    %24 = arith.select %22, %20, %23 : vector<16x32xi1>, vector<16x32xf32>
    %25 = tpu.concatenate %19, %14, %24 in 1 : vector<16x32xf32>, vector<16x32xf32>, vector<16x32xf32> -> vector<16x96xf32>
    %c0_20 = arith.constant 0 : index
    %c0_21 = arith.constant 0 : index
    %26 = vector.load %arg3[%c0_20, %c0_21] : memref<96x32xf32, #tpu.memory_space<vmem>>, vector<96x32xf32>
    %cst_22 = arith.constant dense<0.000000e+00> : vector<16x32xf32>
    %27 = tpu.matmul %25, %26, %cst_22 {dimension_numbers = #tpu.dot_dimension_numbers<[1], [0], [0], [1], [0, 0, 1, 1], [], []>} : vector<16x96xf32>, vector<96x32xf32>, vector<16x32xf32> -> vector<16x32xf32>
    %28 = vector.broadcast %0 : vector<1x32xf32> to vector<16x32xf32>
    %29 = arith.addf %27, %28 : vector<16x32xf32>
    %cst_23 = arith.constant 0.000000e+00 : f32
    %30 = vector.broadcast %cst_23 : f32 to vector<16x32xf32>
    %31 = arith.maximumf %29, %30 : vector<16x32xf32>
    %cst_24 = arith.constant dense<0.000000e+00> : vector<16xf32>
    %32 = vector.multi_reduction <add>, %31, %cst_24 [1] : vector<16x32xf32> to vector<16xf32>
    %33 = vector.shape_cast %32 : vector<16xf32> to vector<16x1xf32>
    %cst_25 = arith.constant 3.200000e+01 : f32
    %34 = vector.broadcast %cst_25 : f32 to vector<16x1xf32>
    %35 = arith.divf %33, %34 : vector<16x1xf32>
    %36 = vector.broadcast %35 : vector<16x1xf32> to vector<16x32xf32>
    %37 = arith.subf %31, %36 : vector<16x32xf32>
    %38 = arith.mulf %37, %37 : vector<16x32xf32>
    %cst_26 = arith.constant dense<0.000000e+00> : vector<16xf32>
    %39 = vector.multi_reduction <add>, %38, %cst_26 [1] : vector<16x32xf32> to vector<16xf32>
    %40 = vector.shape_cast %39 : vector<16xf32> to vector<16x1xf32>
    %cst_27 = arith.constant 3.200000e+01 : f32
    %41 = vector.broadcast %cst_27 : f32 to vector<16x1xf32>
    %42 = arith.divf %40, %41 : vector<16x1xf32>
    %43 = vector.broadcast %35 : vector<16x1xf32> to vector<16x32xf32>
    %44 = arith.subf %31, %43 : vector<16x32xf32>
    %cst_28 = arith.constant 9.99999974E-6 : f32
    %45 = vector.broadcast %cst_28 : f32 to vector<16x1xf32>
    %46 = arith.addf %42, %45 : vector<16x1xf32>
    %47 = math.rsqrt %46 : vector<16x1xf32>
    %48 = vector.broadcast %47 : vector<16x1xf32> to vector<16x32xf32>
    %49 = arith.mulf %44, %48 : vector<16x32xf32>
    %50 = vector.broadcast %1 : vector<1x32xf32> to vector<16x32xf32>
    %51 = arith.mulf %49, %50 : vector<16x32xf32>
    %52 = vector.broadcast %2 : vector<1x32xf32> to vector<16x32xf32>
    %53 = arith.addf %51, %52 : vector<16x32xf32>
    %c1_i32_29 = arith.constant 1 : i32
    %54 = tpu.dynamic_rotate %53 by %c1_i32_29 dim 0 : vector<16x32xf32>, i32 -> vector<16x32xf32>
    %cst_30 = arith.constant 0.000000e+00 : f32
    %55 = vector.shape_cast %10 : vector<16x1xi1> to vector<16x1xi1>
    %56 = vector.broadcast %55 : vector<16x1xi1> to vector<16x32xi1>
    %57 = vector.broadcast %cst_30 : f32 to vector<16x32xf32>
    %58 = arith.select %56, %54, %57 : vector<16x32xi1>, vector<16x32xf32>
    %c15_i32_31 = arith.constant 15 : i32
    %59 = tpu.dynamic_rotate %53 by %c15_i32_31 dim 0 : vector<16x32xf32>, i32 -> vector<16x32xf32>
    %cst_32 = arith.constant 0.000000e+00 : f32
    %60 = vector.shape_cast %12 : vector<16x1xi1> to vector<16x1xi1>
    %61 = vector.broadcast %60 : vector<16x1xi1> to vector<16x32xi1>
    %62 = vector.broadcast %cst_32 : f32 to vector<16x32xf32>
    %63 = arith.select %61, %59, %62 : vector<16x32xi1>, vector<16x32xf32>
    %64 = tpu.concatenate %58, %53, %63 in 1 : vector<16x32xf32>, vector<16x32xf32>, vector<16x32xf32> -> vector<16x96xf32>
    %c0_33 = arith.constant 0 : index
    %c0_34 = arith.constant 0 : index
    %65 = vector.load %arg7[%c0_33, %c0_34] : memref<96x32xf32, #tpu.memory_space<vmem>>, vector<96x32xf32>
    %cst_35 = arith.constant dense<0.000000e+00> : vector<16x32xf32>
    %66 = tpu.matmul %64, %65, %cst_35 {dimension_numbers = #tpu.dot_dimension_numbers<[1], [0], [0], [1], [0, 0, 1, 1], [], []>} : vector<16x96xf32>, vector<96x32xf32>, vector<16x32xf32> -> vector<16x32xf32>
    %67 = vector.broadcast %3 : vector<1x32xf32> to vector<16x32xf32>
    %68 = arith.addf %66, %67 : vector<16x32xf32>
    %cst_36 = arith.constant 0.000000e+00 : f32
    %69 = vector.broadcast %cst_36 : f32 to vector<16x32xf32>
    %70 = arith.maximumf %68, %69 : vector<16x32xf32>
    %cst_37 = arith.constant dense<0.000000e+00> : vector<16xf32>
    %71 = vector.multi_reduction <add>, %70, %cst_37 [1] : vector<16x32xf32> to vector<16xf32>
    %72 = vector.shape_cast %71 : vector<16xf32> to vector<16x1xf32>
    %cst_38 = arith.constant 3.200000e+01 : f32
    %73 = vector.broadcast %cst_38 : f32 to vector<16x1xf32>
    %74 = arith.divf %72, %73 : vector<16x1xf32>
    %75 = vector.broadcast %74 : vector<16x1xf32> to vector<16x32xf32>
    %76 = arith.subf %70, %75 : vector<16x32xf32>
    %77 = arith.mulf %76, %76 : vector<16x32xf32>
    %cst_39 = arith.constant dense<0.000000e+00> : vector<16xf32>
    %78 = vector.multi_reduction <add>, %77, %cst_39 [1] : vector<16x32xf32> to vector<16xf32>
    %79 = vector.shape_cast %78 : vector<16xf32> to vector<16x1xf32>
    %cst_40 = arith.constant 3.200000e+01 : f32
    %80 = vector.broadcast %cst_40 : f32 to vector<16x1xf32>
    %81 = arith.divf %79, %80 : vector<16x1xf32>
    %82 = vector.broadcast %74 : vector<16x1xf32> to vector<16x32xf32>
    %83 = arith.subf %70, %82 : vector<16x32xf32>
    %cst_41 = arith.constant 9.99999974E-6 : f32
    %84 = vector.broadcast %cst_41 : f32 to vector<16x1xf32>
    %85 = arith.addf %81, %84 : vector<16x1xf32>
    %86 = math.rsqrt %85 : vector<16x1xf32>
    %87 = vector.broadcast %86 : vector<16x1xf32> to vector<16x32xf32>
    %88 = arith.mulf %83, %87 : vector<16x32xf32>
    %89 = vector.broadcast %4 : vector<1x32xf32> to vector<16x32xf32>
    %90 = arith.mulf %88, %89 : vector<16x32xf32>
    %91 = vector.broadcast %5 : vector<1x32xf32> to vector<16x32xf32>
    %92 = arith.addf %90, %91 : vector<16x32xf32>
    %93 = vector.broadcast %6 : vector<1x32xf32> to vector<16x32xf32>
    %94 = arith.mulf %92, %93 : vector<16x32xf32>
    %cst_42 = arith.constant dense<0.000000e+00> : vector<16xf32>
    %95 = vector.multi_reduction <add>, %94, %cst_42 [1] : vector<16x32xf32> to vector<16xf32>
    %96 = vector.shape_cast %95 : vector<16xf32> to vector<16x1xf32>
    %97 = vector.broadcast %7 : vector<1x1xf32> to vector<16x1xf32>
    %98 = arith.addf %96, %97 : vector<16x1xf32>
    %c0_43 = arith.constant 0 : index
    %c0_44 = arith.constant 0 : index
    %c0_45 = arith.constant 0 : index
    %99 = vector.load %arg2[%c0_43, %c0_44, %c0_45] : memref<1x16x1xi32, #tpu.memory_space<vmem>>, vector<1x16x1xi32>
    %100 = vector.shape_cast %99 : vector<1x16x1xi32> to vector<16x1xi32>
    %c0_i32 = arith.constant 0 : i32
    %101 = vector.broadcast %c0_i32 : i32 to vector<16x1xi32>
    %102 = arith.cmpi ne, %100, %101 : vector<16x1xi32>
    %cst_46 = arith.constant 0.000000e+00 : f32
    %103 = vector.broadcast %cst_46 : f32 to vector<16x1xf32>
    %104 = arith.select %102, %103, %98 : vector<16x1xi1>, vector<16x1xf32>
    %c0_47 = arith.constant 0 : index
    %c0_48 = arith.constant 0 : index
    %c0_49 = arith.constant 0 : index
    %105 = vector.load %arg13[%c0_47, %c0_48, %c0_49] : memref<1x16x1xf32, #tpu.memory_space<vmem>>, vector<1x16x1xf32>
    %106 = vector.shape_cast %105 : vector<1x16x1xf32> to vector<16x1xf32>
    %107 = vector.shape_cast %104 : vector<16x1xf32> to vector<1x16x1xf32>
    tpu.vector_store %arg13[%c0_47, %c0_48, %c0_49], %107 {strides = array<i32>} : memref<1x16x1xf32, #tpu.memory_space<vmem>>, vector<1x16x1xf32>,
    return
  }
  func.func @transform_0(%arg0: i32) -> (i32, i32, i32) {
    %c0_i32 = arith.constant 0 : i32
    %c0_i32_0 = arith.constant 0 : i32
    %c0_i32_1 = arith.constant 0 : i32
    return %arg0, %c0_i32, %c0_i32_0 : i32, i32, i32
  }
  func.func @transform_1(%arg0: i32) -> (i32, i32, i32) {
    %c0_i32 = arith.constant 0 : i32
    %c0_i32_0 = arith.constant 0 : i32
    %c0_i32_1 = arith.constant 0 : i32
    return %arg0, %c0_i32, %c0_i32_0 : i32, i32, i32
  }
  func.func @transform_2(%arg0: i32) -> (i32, i32) {
    %c0_i32 = arith.constant 0 : i32
    %c0_i32_0 = arith.constant 0 : i32
    %c0_i32_1 = arith.constant 0 : i32
    return %c0_i32, %c0_i32_0 : i32, i32
  }
  func.func @transform_3(%arg0: i32) -> (i32, i32) {
    %c0_i32 = arith.constant 0 : i32
    %c0_i32_0 = arith.constant 0 : i32
    %c0_i32_1 = arith.constant 0 : i32
    return %c0_i32, %c0_i32_0 : i32, i32
  }
  func.func @transform_4(%arg0: i32) -> (i32, i32) {
    %c0_i32 = arith.constant 0 : i32
    %c0_i32_0 = arith.constant 0 : i32
    %c0_i32_1 = arith.constant 0 : i32
    return %c0_i32, %c0_i32_0 : i32, i32
  }
  func.func @transform_5(%arg0: i32) -> (i32, i32) {
    %c0_i32 = arith.constant 0 : i32
    %c0_i32_0 = arith.constant 0 : i32
    %c0_i32_1 = arith.constant 0 : i32
    return %c0_i32, %c0_i32_0 : i32, i32
  }
  func.func @transform_6(%arg0: i32) -> (i32, i32) {
    %c0_i32 = arith.constant 0 : i32
    %c0_i32_0 = arith.constant 0 : i32
    %c0_i32_1 = arith.constant 0 : i32
    return %c0_i32, %c0_i32_0 : i32, i32
  }
  func.func @transform_7(%arg0: i32) -> (i32, i32) {
    %c0_i32 = arith.constant 0 : i32
    %c0_i32_0 = arith.constant 0 : i32
    %c0_i32_1 = arith.constant 0 : i32
    return %c0_i32, %c0_i32_0 : i32, i32
  }
  func.func @transform_8(%arg0: i32) -> (i32, i32) {
    %c0_i32 = arith.constant 0 : i32
    %c0_i32_0 = arith.constant 0 : i32
    %c0_i32_1 = arith.constant 0 : i32
    return %c0_i32, %c0_i32_0 : i32, i32
  }
  func.func @transform_9(%arg0: i32) -> (i32, i32) {
    %c0_i32 = arith.constant 0 : i32
    %c0_i32_0 = arith.constant 0 : i32
    %c0_i32_1 = arith.constant 0 : i32
    return %c0_i32, %c0_i32_0 : i32, i32
  }
  func.func @transform_10(%arg0: i32) -> (i32, i32) {
    %c0_i32 = arith.constant 0 : i32
    %c0_i32_0 = arith.constant 0 : i32
    %c0_i32_1 = arith.constant 0 : i32
    return %c0_i32, %c0_i32_0 : i32, i32
  }
  func.func @transform_11(%arg0: i32) -> (i32, i32) {
    %c0_i32 = arith.constant 0 : i32
    %c0_i32_0 = arith.constant 0 : i32
    %c0_i32_1 = arith.constant 0 : i32
    return %c0_i32, %c0_i32_0 : i32, i32
  }
  func.func @transform_12(%arg0: i32) -> (i32, i32, i32) {
    %c0_i32 = arith.constant 0 : i32
    %c0_i32_0 = arith.constant 0 : i32
    %c0_i32_1 = arith.constant 0 : i32
    return %arg0, %c0_i32, %c0_i32_0 : i32, i32, i32
  }
}

</mosaic_0001>

<bundles_post_ra>
// kernel: tpu_custom_call.1
= control target key start
LH: loop header
LB: loop body
LE: loop exit
PB: predicated region body
PF: predicated region fallthrough
CT: control target
= control target key end

     0   :  { %s1169_s23 = smov 0   ;;  %s1350_s0 = inlined_call_operand.vmem [shape: f32[2,16,32], index: 0, kind: input, shape index: {}]   ;;  %s1351_s1 = inlined_call_operand.vmem [shape: s32[2,16,1], index: 1, kind: input, shape index: {}]   ;;  %s1352_s2 = inlined_call_operand.vmem [shape: f32[96,32], index: 2, kind: input, shape index: {}]   ;;  %s1353_s3 = inlined_call_operand.vmem [shape: f32[1,32], index: 3, kind: input, shape index: {}]   ;;  %s1354_s4 = inlined_call_operand.vmem [shape: f32[1,32], index: 4, kind: input, shape index: {}]   ;;  %s1355_s5 = inlined_call_operand.vmem [shape: f32[1,32], index: 5, kind: input, shape index: {}]   ;;  %s1356_s6 = inlined_call_operand.vmem [shape: f32[96,32], index: 6, kind: input, shape index: {}]   ;;  %s1357_s7 = inlined_call_operand.vmem [shape: f32[1,32], index: 7, kind: input, shape index: {}]   ;;  %s1358_s8 = inlined_call_operand.vmem [shape: f32[1,32], index: 8, kind: input, shape index: {}]   ;;  %s1359_s9 = inlined_call_operand.vmem [shape: f32[1,32], index: 9, kind: input, shape index: {}]   ;;  %s1360_s10 = inlined_call_operand.vmem [shape: f32[1,32], index: 10, kind: input, shape index: {}]   ;;  %s1361_s11 = inlined_call_operand.<no memory space> [shape: f32[1,1], index: 11, kind: input, shape index: {}]   ;;  %s1362_s12 = inlined_call_operand.vmem [shape: f32[2,16,1], index: 12, kind: output, shape index: {}]  }
   0x1   :  { %v17_v0 = vstv %s1361_s11 }
   0x2   :  { %18 = vst [vmem:[#allocation2] sm:$0x1] %v17_v0 }
   0x3 LB: > { %s915_s24 = sadd.s32 4294967295, %s1097_s23   ;;  %p919_p0 = scmp.ge.s32.totalorder %s1097_s23, 1  ;;  %s1097_s23 = sphi %s1169_s23, %s24_s23  }
   0x4   : > { %p374_p1 = scmp.lt.s32.totalorder %s1097_s23, 3 }
   0x6   : > { %p375_p2 = pnand %p919_p0, %p374_p1 }
   0x7   : > { %p421_p3 = scmp.lt.s32.totalorder (!%p375_p2), %s915_s24, 1  ;;  %v444_v1 = vlaneseq (!%p375_p2)  ;;  %v497_v2 = vld [vmem:[%s1352_s2] sm:$0xff] (!%p375_p2)  ;;  %v498_v3 = vld [vmem:[%s1352_s2 + $0x8] sm:$0xff] (!%p375_p2)  ;;  %v499_v4 = vld [vmem:[%s1352_s2 + $0x10] sm:$0xff] (!%p375_p2)  ;;  %s1100_s27 = smov (!%p375_p2), 64   ;;  %vm491_vm4 = vcmask (!%p375_p2), 261120  }
   0x8   : > { %378 = sbr.rel (%p375_p2) target bundleno = 1482 (0x5ca), region = 68  ;;  %v1025_v5 = vpack.c.bf16 (!%p375_p2), %v498_v3, %v497_v2  ;;  %v500_v6 = vld [vmem:[%s1352_s2 + $0x18] sm:$0xff] (!%p375_p2)  ;;  %v501_v9 = vld [vmem:[%s1352_s2 + $0x20] sm:$0xff] (!%p375_p2)  ;;  %v502_v10 = vld [vmem:[%s1352_s2 + $0x28] sm:$0xff] (!%p375_p2)  ;;  %vm494_vm5 = vcmask (!%p375_p2), 523264   ;;  %vm515_vm6 = vcmask (!%p375_p2), 785408  }
   0x9   : > { %v1189_v7 = vshrl.u32 (!%p375_p2), %v444_v1, 7  ;;  %v1029_v8 = vpack.c.bf16 (!%p375_p2), %v500_v6, %v499_v4  ;;  %v1033_v12 = vpack.c.bf16 (!%p375_p2), %v502_v10, %v501_v9  ;;  %v503_v13 = vld [vmem:[%s1352_s2 + $0x30] sm:$0xff] (!%p375_p2)  ;;  %v504_v14 = vld [vmem:[%s1352_s2 + $0x38] sm:$0xff] (!%p375_p2)  ;;  %v505_v26 = vld [vmem:[%s1352_s2 + $0x40] sm:$0xff] (!%p375_p2)  ;;  %vm845_vm8 = vcmask (!%p375_p2), 7168  }
   0xa   : > { %1026 = vmatprep.subr.bf16.mxu0 (!%p375_p2), %v1025_v5  ;;  %v1037_v21 = vpack.c.bf16 (!%p375_p2), %v504_v14, %v503_v13  ;;  %v506_v27 = vld [vmem:[%s1352_s2 + $0x48] sm:$0xff] (!%p375_p2)  ;;  %v507_v30 = vld [vmem:[%s1352_s2 + $0x50] sm:$0xff] (!%p375_p2)  ;;  %v508_v31 = vld [vmem:[%s1352_s2 + $0x58] sm:$0xff] (!%p375_p2) }
   0xb   : > { %v1200_v11 = vadd.s32 (!%p375_p2), 8, %v1189_v7  ;;  %1028 = vmatpush3.bf16.msra.mxu0 (!%p375_p2), %v1025_v5  ;;  %vm466_vm0 = vcmp.lt.s32.totalorder (!%p375_p2), %v1189_v7, 7  ;;  %vm455_vm1 = vcmp.lt.s32.totalorder (!%p375_p2), %v1189_v7, 1  ;;  %v1041_v29 = vpack.c.bf16 (!%p375_p2), %v506_v27, %v505_v26  ;;  %v926_v42 = vld [vmem:[%s1353_s3] ss:$0 sm:$0xff] (!%p375_p2)  ;;  %v675_v62 = vld [vmem:[%s1356_s6 + $0x8] sm:$0xff] (!%p375_p2) }
   0xc   : > { %1030 = vmatprep.subr.bf16.mxu0 (!%p375_p2), %v1029_v8  ;;  %v1045_v32 = vpack.c.bf16 (!%p375_p2), %v508_v31, %v507_v30  ;;  %vm447_vm3 = vcmp.ge.s32.totalorder (!%p375_p2), %v1189_v7, 1  ;;  %v674_v61 = vld [vmem:[%s1356_s6] sm:$0xff] (!%p375_p2)  ;;  %v676_v63 = vld [vmem:[%s1356_s6 + $0x10] sm:$0xff] (!%p375_p2)  ;;  %v677_v1 = vld [vmem:[%s1356_s6 + $0x18] sm:$0xff] (!%p375_p2) }
   0xd   : > { %vm450_vm2 = vcmp.le.s32.totalorder (!%p375_p2), %v1200_v11, 14  ;;  %v1049_v0 = vpack.c.bf16 (!%p375_p2), %v675_v62, %v674_v61  ;;  %v1053_v2 = vpack.c.bf16 (!%p375_p2), %v677_v1, %v676_v63  ;;  %v678_v3 = vld [vmem:[%s1356_s6 + $0x20] sm:$0xff] (!%p375_p2)  ;;  %v679_v4 = vld [vmem:[%s1356_s6 + $0x28] sm:$0xff] (!%p375_p2)  ;;  %v680_v13 = vld [vmem:[%s1356_s6 + $0x30] sm:$0xff] (!%p375_p2) }
   0xe   : > { %v1057_v5 = vpack.c.bf16 (!%p375_p2), %v679_v4, %v678_v3  ;;  %v681_v14 = vld [vmem:[%s1356_s6 + $0x38] sm:$0xff] (!%p375_p2)  ;;  %v930_v26 = vld [vmem:[%s1355_s5] ss:$0 sm:$0xff] (!%p375_p2) }
   0xf   : > { %s1364_s24 = smov (!%p421_p3, %s915_s24), 1  ;;  %1032 = vmatpush3.bf16.msra.mxu0 %v1029_v8  ;;  %1050 = vmatprep.subr.bf16.mxu1 %v1049_v0  ;;  %v931_v7 = vld [vmem:[%s1357_s7] ss:$0 sm:$0xff] }
  0x10   : > { %s1197_s18 = sshll.u32 %s1364_s24, 4  ;;  %s1099_s24 = smov 32   ;;  %1034 = vmatprep.subr.bf16.mxu0 %v1033_v12  ;;  %1052 = vmatpush3.bf16.msra.mxu1 %v1049_v0 }
  0x11   : > { %s425_s21 = scalar_lea.vmem %s1350_s0, %s1197_s18  ;;  %1054 = vmatprep.subr.bf16.mxu1 %v1053_v2  ;;  %s430_s29 = scalar_lea.vmem %s1351_s1, %s1197_s18 }
  0x12   : > { %v451_v15 = vld [vmem:[%s425_s21] sm:$0xff]  ;;  %v452_v16 = vld [vmem:[%s425_s21 + $0x8] sm:$0xff]  ;;  %s435_s14 = scalar_lea.vmem %s1362_s12, %s1197_s18 }
  0x13   : > { %v454_v17 = vrot.slane %v452_v16, 7  ;;  %477 = vrot.lane.b32.xlu0 %v451_v15, %s1099_s24  ;;  %v453_v18 = vrot.slane %v451_v15, 7  ;;  %v464_v19 = vrot.slane %v451_v15, 1  ;;  %v465_v20 = vrot.slane %v452_v16, 1  ;;  %1036 = vmatpush3.bf16.msra.mxu0 %v1033_v12 }
  0x14   : > { %1038 = vmatprep.subr.bf16.mxu0 %v1037_v21  ;;  %1056 = vmatpush3.bf16.msra.mxu1 %v1053_v2 }
  0x15   : > { %v467_v22 = vsel %vm466_vm0, %v464_v19, %v465_v20  ;;  %v468_v23 = vsel %vm466_vm0, %v465_v20, %v464_v19  ;;  %v457_v24 = vsel %vm455_vm1, %v454_v17, %v453_v18  ;;  %v456_v25 = vsel %vm455_vm1, %v453_v18, %v454_v17  ;;  %1058 = vmatprep.subr.bf16.mxu1 %v1057_v5  ;;  %v682_v17 = vld [vmem:[%s1356_s6 + $0x40] sm:$0xff]  ;;  %v683_v18 = vld [vmem:[%s1356_s6 + $0x48] sm:$0xff]  ;;  %v684_v20 = vld [vmem:[%s1356_s6 + $0x50] sm:$0xff] }
  0x16   : > { %485 = vrot.lane.b32.xlu1 %v467_v22, %s1100_s27  ;;  %v474_v28 = vsel %vm450_vm2, %v468_v23, 0.0  ;;  %v462_v33 = vsel %vm447_vm3, %v457_v24, 0.0  ;;  %v1065_v19 = vpack.c.bf16 %v683_v18, %v682_v17  ;;  %v929_v23 = vld [vmem:[%s1354_s4] ss:$0 sm:$0xff] }
  0x17   : > { %479 = vrot.lane.b32.xlu0 %v452_v16, %s1099_s24  ;;  %1040 = vmatpush3.bf16.msra.mxu0 %v1037_v21  ;;  %v1061_v16 = vpack.c.bf16 %v681_v14, %v680_v13  ;;  %v685_v21 = vld [vmem:[%s1356_s6 + $0x58] sm:$0xff]  ;;  %v934_v13 = vld [vmem:[%s1358_s8] ss:$0 sm:$0xff] }
  0x18   : > { %1042 = vmatprep.subr.bf16.mxu0 %v1041_v29  ;;  %1060 = vmatpush3.bf16.msra.mxu1 %v1057_v5  ;;  %v1069_v24 = vpack.c.bf16 %v685_v21, %v684_v20  ;;  %v936_v18 = vld [vmem:[%s1360_s10] ss:$0 sm:$0xff] }
  0x19   : > { %1062 = vmatprep.subr.bf16.mxu1 %v1061_v16 }
  0x1a   : > { %487 = vrot.lane.b32.xlu1 %v474_v28, %s1100_s27 }
  0x1b   : > { %1044 = vmatpush3.bf16.msra.mxu0 %v1041_v29 }
  0x1c   : > { %1046 = vmatprep.subr.bf16.mxu0 %v1045_v32  ;;  %1064 = vmatpush3.bf16.msra.mxu1 %v1061_v16 }
  0x1d   : > { %1066 = vmatprep.subr.bf16.mxu1 %v1065_v19 }
  0x1f   : > { %1048 = vmatpush3.bf16.msra.mxu0 %v1045_v32 }
  0x20   : > { %1068 = vmatpush3.bf16.msra.mxu1 %v1065_v19 }
  0x21   : > { %1070 = vmatprep.subr.bf16.mxu1 %v1069_v24 }
  0x24   : > { %1072 = vmatpush3.bf16.msra.mxu1 %v1069_v24 }
  0x85   : > { %v478_v34 = vpop.permute.xlu0 %477 }
  0x86   : > { %v492_v35 = vsel %vm491_vm4, %v462_v33, %v478_v34 }
  0x88   : > { %v486_v36 = vpop.permute.xlu1 %485 }
  0x89   : > { %v495_v37 = vsel %vm494_vm5, %v492_v35, %v486_v36  ;;  %v480_v38 = vpop.permute.xlu0 %479 }
  0x8a   : > { %995 = vmatprep.mubr.msk.f32.mxu0 %vm515_vm6, %v495_v37  ;;  %v493_v39 = vsel %vm491_vm4, %v456_v25, %v480_v38 }
  0x8c   : > { %v488_v40 = vpop.permute.xlu1 %487 }
  0x8d   : > { %v496_v41 = vsel %vm494_vm5, %v493_v39, %v488_v40 }
  0x8e   : > { %996 = vmatmul.mubr.msk.f32.vlgmr.msra.gmra.mrb[0].mxu0 %vm515_vm6, %v496_v41 }
 0x161   : > { %v997_v43 = vpop.f32.mrb[0].mxu0 }
 0x162   : > { %v594_v44 = vadd.f32 %v997_v43, %v926_v42  ;;  %v588_v45 = vpop.f32.mrb[1].mxu0 }
 0x163   : > { %v589_v46 = vadd.f32 %v926_v42, %v588_v45 }
 0x164   : > { %v598_v47 = vmax.f32 %v594_v44, 0.0 }
 0x165   : > { %v597_v48 = vmax.f32 %v589_v46, 0.0 }
 0x166   : > { %v602_v49 = vsel %vm491_vm4, %v598_v47, 0.0 }
 0x167   : > { %603 = vadd.xlane.f32.xlu1 %v602_v49  ;;  %v599_v50 = vsel %vm491_vm4, %v597_v48, 0.0 }
 0x168   : > { %600 = vadd.xlane.f32.xlu0 %v599_v50 }
 0x1f4   : > { %v604_v51 = vpop.xlane.xlu1 %603 }
 0x1f5   : > { %v607_v52 = vmul.f32 0.03125, %v604_v51  ;;  %v601_v53 = vpop.xlane.xlu0 %600 }
 0x1f6   : > { %v606_v54 = vmul.f32 0.03125, %v601_v53 }
 0x1f7   : > { %v609_v55 = vsub.f32 %v598_v47, %v607_v52 }
 0x1f8   : > { %v608_v56 = vsub.f32 %v597_v48, %v606_v54 }
 0x1f9   : > { %v611_v59 = vmul.f32 %v609_v55, %v609_v55 }
 0x1fa   : > { %v610_v57 = vmul.f32 %v608_v56, %v608_v56 }
 0x1fb   : > { %v615_v60 = vsel %vm491_vm4, %v611_v59, 0.0 }
 0x1fc   : > { %v612_v58 = vsel %vm491_vm4, %v610_v57, 0.0 }
 0x1fd   : > { %613 = vadd.xlane.f32.xlu0 %v612_v58 }
 0x201   : > { %616 = vadd.xlane.f32.xlu0 %v615_v60 }
 0x28a   : > { %v614_v6 = vpop.xlane.xlu0 %613 }
 0x28b   : > { %v618_v8 = vmul.f32 0.03125, %v614_v6 }
 0x28d   : > { %v620_v9 = vadd.f32 1e-05, %v618_v8 }
 0x28e   : > { %v617_v10 = vpop.xlane.xlu0 %616 }
 0x28f   : > { %1083 = vrsqrt.f32 %v620_v9  ;;  %v619_v12 = vmul.f32 0.03125, %v617_v10 }
 0x291   : > { %v621_v15 = vadd.f32 1e-05, %v619_v12 }
 0x293   : > { %1085 = vrsqrt.f32 %v621_v15  ;;  %v935_v15 = vld [vmem:[%s1359_s9] ss:$0 sm:$0xff] }
 0x299   : > { %v1084_v22 = vpop.eup %1083 }
 0x29a   : > { %v624_v25 = vmul.f32 %v1084_v22, %v608_v56 }
 0x29c   : > { %v632_v27 = vmul.f32 %v929_v23, %v624_v25 }
 0x29d   : > { %v1086_v28 = vpop.eup %1085 }
 0x29e   : > { %v640_v29 = vadd.f32 %v930_v26, %v632_v27  ;;  %v625_v30 = vmul.f32 %v1086_v28, %v609_v55  ;;  %v839_v27 = vld [vmem:[%s430_s29] sm:$0xff] }
 0x29f   : > { %v937_v28 = vld [vmem:[#allocation2] ss:$0 sm:$0xff]  ;;  %vm841_vm7 = vcmp.ne.s32.totalorder %v839_v27, 0 }
 0x2a0   : > { %656 = vrot.lane.b32.xlu1 %v640_v29, %s1099_s24  ;;  %v633_v31 = vmul.f32 %v929_v23, %v625_v30  ;;  %v642_v33 = vrot.slane %v640_v29, 7  ;;  %v648_v35 = vrot.slane %v640_v29, 1 }
 0x2a2   : > { %v641_v32 = vadd.f32 %v930_v26, %v633_v31  ;;  %v840_v31 = vld [vmem:[%s430_s29 + $0x8] sm:$0xff] }
 0x2a3   : > { %vm842_vm9 = vcmp.ne.s32.totalorder %v840_v31, 0 }
 0x2a4   : > { %658 = vrot.lane.b32.xlu0 %v641_v32, %s1099_s24  ;;  %v643_v34 = vrot.slane %v641_v32, 7  ;;  %v649_v36 = vrot.slane %v641_v32, 1 }
 0x2a6   : > { %v650_v37 = vsel %vm466_vm0, %v648_v35, %v649_v36  ;;  %v645_v38 = vsel %vm455_vm1, %v643_v34, %v642_v33  ;;  %v644_v39 = vsel %vm455_vm1, %v642_v33, %v643_v34  ;;  %v651_v40 = vsel %vm466_vm0, %v649_v36, %v648_v35 }
 0x2a7   : > { %664 = vrot.lane.b32.xlu1 %v650_v37, %s1100_s27  ;;  %v653_v41 = vsel %vm450_vm2, %v651_v40, 0.0  ;;  %v646_v43 = vsel %vm447_vm3, %v645_v38, 0.0 }
 0x2ab   : > { %666 = vrot.lane.b32.xlu1 %v653_v41, %s1100_s27 }
 0x312   : > { %v657_v42 = vpop.permute.xlu1 %656 }
 0x313   : > { %v670_v44 = vsel %vm491_vm4, %v646_v43, %v657_v42 }
 0x316   : > { %v659_v46 = vpop.permute.xlu0 %658 }
 0x317   : > { %v671_v48 = vsel %vm491_vm4, %v644_v39, %v659_v46 }
 0x319   : > { %v665_v45 = vpop.permute.xlu1 %664 }
 0x31a   : > { %v672_v47 = vsel %vm494_vm5, %v670_v44, %v665_v45 }
 0x31b   : > { %1022 = vmatprep.mubr.msk.f32.mxu1 %vm515_vm6, %v672_v47 }
 0x31d   : > { %v667_v49 = vpop.permute.xlu1 %666 }
 0x31e   : > { %v673_v11 = vsel %vm494_vm5, %v671_v48, %v667_v49 }
 0x31f   : > { %1023 = vmatmul.mubr.msk.f32.vlgmr.msra.gmra.mrb[0].mxu1 %vm515_vm6, %v673_v11 }
 0x3f2   : > { %v1024_v50 = vpop.f32.mrb[0].mxu1 }
 0x3f3   : > { %v770_v51 = vadd.f32 %v1024_v50, %v931_v7  ;;  %v764_v52 = vpop.f32.mrb[1].mxu1 }
 0x3f4   : > { %v765_v53 = vadd.f32 %v931_v7, %v764_v52 }
 0x3f5   : > { %v774_v54 = vmax.f32 %v770_v51, 0.0 }
 0x3f6   : > { %v773_v55 = vmax.f32 %v765_v53, 0.0 }
 0x3f7   : > { %v778_v56 = vsel %vm491_vm4, %v774_v54, 0.0 }
 0x3f8   : > { %779 = vadd.xlane.f32.xlu1 %v778_v56  ;;  %v775_v57 = vsel %vm491_vm4, %v773_v55, 0.0 }
 0x3f9   : > { %776 = vadd.xlane.f32.xlu0 %v775_v57 }
 0x485   : > { %v780_v58 = vpop.xlane.xlu1 %779 }
 0x486   : > { %v782_v59 = vmul.f32 0.03125, %v780_v58  ;;  %v777_v60 = vpop.xlane.xlu0 %776 }
 0x487   : > { %v781_v61 = vmul.f32 0.03125, %v777_v60 }
 0x488   : > { %v784_v62 = vsub.f32 %v774_v54, %v782_v59 }
 0x489   : > { %v783_v63 = vsub.f32 %v773_v55, %v781_v61 }
 0x48a   : > { %v786_v2 = vmul.f32 %v784_v62, %v784_v62 }
 0x48b   : > { %v785_v0 = vmul.f32 %v783_v63, %v783_v63 }
 0x48c   : > { %v790_v3 = vsel %vm491_vm4, %v786_v2, 0.0 }
 0x48d   : > { %v787_v1 = vsel %vm491_vm4, %v785_v0, 0.0 }
 0x48e   : > { %788 = vadd.xlane.f32.xlu0 %v787_v1 }
 0x492   : > { %791 = vadd.xlane.f32.xlu0 %v790_v3 }
 0x51b   : > { %v789_v4 = vpop.xlane.xlu0 %788 }
 0x51c   : > { %v793_v5 = vmul.f32 0.03125, %v789_v4 }
 0x51e   : > { %v795_v6 = vadd.f32 1e-05, %v793_v5 }
 0x51f   : > { %v792_v8 = vpop.xlane.xlu0 %791 }
 0x520   : > { %1087 = vrsqrt.f32 %v795_v6  ;;  %v794_v9 = vmul.f32 0.03125, %v792_v8 }
 0x522   : > { %v796_v10 = vadd.f32 1e-05, %v794_v9 }
 0x524   : > { %1089 = vrsqrt.f32 %v796_v10 }
 0x52a   : > { %v1088_v12 = vpop.eup %1087 }
 0x52b   : > { %v799_v14 = vmul.f32 %v1088_v12, %v783_v63 }
 0x52d   : > { %v807_v16 = vmul.f32 %v934_v13, %v799_v14 }
 0x52e   : > { %v1090_v17 = vpop.eup %1089 }
 0x52f   : > { %v815_v19 = vadd.f32 %v935_v15, %v807_v16  ;;  %v800_v20 = vmul.f32 %v1090_v17, %v784_v62 }
 0x531   : > { %v823_v21 = vmul.f32 %v936_v18, %v815_v19  ;;  %v808_v22 = vmul.f32 %v934_v13, %v800_v20 }
 0x533   : > { %v825_v23 = vsel %vm491_vm4, %v823_v21, 0.0  ;;  %v816_v24 = vadd.f32 %v935_v15, %v808_v22 }
 0x534   : > { %826 = vadd.xlane.f32.xlu1 %v825_v23 }
 0x535   : > { %v824_v25 = vmul.f32 %v936_v18, %v816_v24 }
 0x537   : > { %v828_v26 = vsel %vm491_vm4, %v824_v25, 0.0 }
 0x538   : > { %829 = vadd.xlane.f32.xlu0 %v828_v26 }
 0x5c1   : > { %v827_v29 = vpop.xlane.xlu1 %826 }
 0x5c2   : > { %v837_v30 = vadd.f32 %v937_v28, %v827_v29 }
 0x5c4   : > { %v843_v32 = vsel %vm841_vm7, 0.0, %v837_v30 }
 0x5c5   : > { %846 = vst.msk [vmem:[%s435_s14] sm:$0xff] %vm845_vm8, %v843_v32  ;;  %v830_v33 = vpop.xlane.xlu0 %829 }
 0x5c6   : > { %v838_v34 = vadd.f32 %v937_v28, %v830_v33 }
 0x5c8   : > { %v844_v35 = vsel %vm842_vm9, 0.0, %v838_v34 }
 0x5c9   : > { %847 = vst.msk [vmem:[%s435_s14 + $0x8] sm:$0xff] %vm845_vm8, %v844_v35 }
 0x5ca PF: > { %s24_s23 = sadd.s32 1, %s1097_s23  }
 0x5cb   : > { %p21_p4 = scmp.ge.s32.totalorder %s24_s23, 4  }
 0x5cd   :  { %23 = sbr.rel (!%p21_p4) target bundleno = 3 (0x3), region = 101 }

</bundles_post_ra>
